<compile_context>
chip_gen: v7x
topology: tpu7x:2x2x1
jax: 0.10.0
libtpu: 0.0.40
codegen_flags: <defaults>
</compile_context>

<pallas_src>
import functools

import jax
import jax.numpy as jnp
from jax import lax
from jax.experimental import pallas as pl
from jax.experimental.pallas import tpu as pltpu


def _dice_partials_kernel(score_ref, target_ref, out_ref, *,
                          softmax, n_classes, tm_rows, hw, need_mask):
    """Accumulates per-class (intersect, y_sum, z_sum) partial sums.

    score_ref : (1, C, tm_rows, 128)  input dtype
    target_ref: (1, tm_rows, 128)     int8 class ids (wrapper pad = n_classes)
    out_ref   : (1, 3*C, 8, 128)      f32, resident across the spatial grid axis
    """
    h = pl.program_id(1)
    n_h = pl.num_programs(1)

    @pl.when(h == 0)
    def _():
        out_ref[...] = jnp.zeros_like(out_ref)

    def fold(x):
        # (tm_rows, 128) -> (8, 128): vreg-aligned grouped sum (pure vadds,
        # no cross-lane / cross-sublane work in the steady state).
        if tm_rows == 8:
            return x
        return jnp.sum(x.reshape(tm_rows // 8, 8, 128), axis=0)

    def accumulate(masked):
        tgt = target_ref[0].astype(jnp.int32)                    # (tm_rows, 128)
        if masked:
            row = lax.broadcasted_iota(jnp.int32, (tm_rows, 128), 0)
            col = lax.broadcasted_iota(jnp.int32, (tm_rows, 128), 1)
            flat = (h * tm_rows + row) * 128 + col
            valid = flat < hw
            tgt = jnp.where(valid, tgt, n_classes)                # -> one-hot 0

        s = [score_ref[0, c].astype(jnp.float32) for c in range(n_classes)]

        if softmax:
            # Class softmax over C dense slabs: elementwise max/sub/exp/add/div.
            m = s[0]
            for c in range(1, n_classes):
                m = jnp.maximum(m, s[c])
            e = [jnp.exp(sc - m) for sc in s]
            denom = e[0]
            for c in range(1, n_classes):
                denom = denom + e[c]
            inv = 1.0 / denom
            s = [ec * inv for ec in e]

        if masked:
            # Discard out-of-bounds rows / padded columns (where-select also
            # drops any NaN/Inf produced by exp of garbage in the OOB rows).
            s = [jnp.where(valid, sc, 0.0) for sc in s]

        for c in range(n_classes):
            sc = s[c]
            tc = tgt == c
            out_ref[0, 3 * c + 0] += fold(jnp.where(tc, sc, 0.0))   # intersect
            out_ref[0, 3 * c + 1] += fold(jnp.where(tc, 1.0, 0.0))  # y_sum (t*t == t)
            out_ref[0, 3 * c + 2] += fold(sc * sc)                  # z_sum

    if need_mask:
        @pl.when(h < n_h - 1)
        def _():
            accumulate(masked=False)

        @pl.when(h == n_h - 1)
        def _():
            accumulate(masked=True)
    else:
        accumulate(masked=False)


def dice_loss_pallas(inputs, target, weight, *, softmax=False, block_rows=None):
    """inputs: (N, C, H, W) float, target: (N, H, W) int, weight: (C,) float."""
    N, C, H, W = inputs.shape
    HW = H * W

    # Pad the flattened spatial axis to a multiple of 8*128 so it reshapes to a
    # dense, vreg-aligned (rows, 128) layout.  Scores pad with 0 and labels
    # with an invalid class id, so the unmasked paths see no spurious
    # contribution; the softmax-over-padded-columns case is masked in-kernel.
    HW_pad = ((HW + 1023) // 1024) * 1024
    rows = HW_pad // 128

    score = inputs.reshape(N, C, HW)
    labels = target.reshape(N, HW).astype(jnp.int8)
    if HW_pad != HW:
        score = jnp.pad(score, ((0, 0), (0, 0), (0, HW_pad - HW)))
        labels = jnp.pad(labels, ((0, 0), (0, HW_pad - HW)), constant_values=C)
    score = score.reshape(N, C, rows, 128)
    labels = labels.reshape(N, rows, 128)

    # ~2 MiB score blocks amortise the ~0.35 us per-grid-step overhead; the row
    # tile is kept a multiple of 32 (int8 label sublane packing) unless the
    # block spans the full (8-aligned) row extent.
    if block_rows is None:
        block_rows = (2 << 20) // (C * 128 * score.dtype.itemsize)
    tm_rows = max(32, (block_rows // 32) * 32)
    if tm_rows >= rows:
        tm_rows = rows
    n_h = pl.cdiv(rows, tm_rows)

    # Masking only runs on the last spatial tile: needed when the last block
    # overruns the padded array, and under softmax when the wrapper pad is
    # non-empty (softmax of zero-padded score columns is not 0).
    need_mask = (rows % tm_rows != 0) or (softmax and HW_pad != HW)

    kernel = functools.partial(
        _dice_partials_kernel, softmax=softmax, n_classes=C,
        tm_rows=tm_rows, hw=HW, need_mask=need_mask)

    partials = pl.pallas_call(
        kernel,
        out_shape=jax.ShapeDtypeStruct((N, 3 * C, 8, 128), jnp.float32),
        grid_spec=pltpu.PrefetchScalarGridSpec(
            num_scalar_prefetch=0,
            grid=(N, n_h),
            in_specs=[
                pl.BlockSpec((1, C, tm_rows, 128), lambda n, h: (n, 0, h, 0)),
                pl.BlockSpec((1, tm_rows, 128), lambda n, h: (n, h, 0)),
            ],
            out_specs=pl.BlockSpec((1, 3 * C, 8, 128),
                                   lambda n, h: (n, 0, 0, 0)),
        ),
        compiler_params=pltpu.CompilerParams(
            dimension_semantics=("parallel", "arbitrary")),
    )(score, labels)
    # TODO(synk): for v7x small-batch cases, add a second parallel grid axis
    # that splits the spatial row tiles across both TensorCores.

    # O(C) epilogue: combine the per-batch vreg partials and compute the
    # weighted dice loss.
    stats = jnp.sum(partials.reshape(N, C, 3, 8 * 128), axis=(0, 3))   # (C, 3)
    intersect, y_sum, z_sum = stats[:, 0], stats[:, 1], stats[:, 2]
    smooth = 1e-5
    dice = 1.0 - (2.0 * intersect + smooth) / (z_sum + y_sum + smooth)
    w = jnp.asarray(weight, jnp.float32).reshape(C)
    return jnp.sum(dice * w) / C


def dice_loss_ref(inputs, target, weight, *, softmax=False):
    """Plain-JAX reference mirroring the PyTorch module."""
    n_classes = inputs.shape[1]
    if softmax:
        inputs = jax.nn.softmax(inputs, axis=1)
    onehot = jax.nn.one_hot(target, n_classes, axis=1, dtype=jnp.float32)
    smooth = 1e-5
    loss = 0.0
    for i in range(n_classes):
        s = inputs[:, i].astype(jnp.float32)
        t = onehot[:, i]
        intersect = jnp.sum(s * t)
        y_sum = jnp.sum(t * t)
        z_sum = jnp.sum(s * s)
        dice = 1.0 - (2.0 * intersect + smooth) / (z_sum + y_sum + smooth)
        loss = loss + dice * weight[i]
    return loss / n_classes


if __name__ == "__main__":
    key = jax.random.PRNGKey(0)
    k1, k2, k3, k4 = jax.random.split(key, 4)

    n_classes = 4
    weight = jnp.array([1.0, 0.8, 1.2, 1.0], dtype=jnp.float32)

    # Small case: HW = 256 -> padded to one dense (8, 128) row block.
    N, H, W = 2, 16, 16
    inputs = jax.random.normal(k1, (N, n_classes, H, W), dtype=jnp.float32)
    target = jax.random.randint(k2, (N, H, W), 0, n_classes, dtype=jnp.int32)

    out = dice_loss_pallas(inputs, target, weight, softmax=False)
    jax.block_until_ready(out)
    ref = dice_loss_ref(inputs, target, weight, softmax=False)
    assert jnp.allclose(out, ref, rtol=1e-5, atol=1e-5), (out, ref)

    out_sm = dice_loss_pallas(inputs, target, weight, softmax=True)
    jax.block_until_ready(out_sm)
    ref_sm = dice_loss_ref(inputs, target, weight, softmax=True)
    assert jnp.allclose(out_sm, ref_sm, rtol=1e-5, atol=1e-5), (out_sm, ref_sm)

    # Ragged, multi-tile case: HW = 5040 -> padded to 5120 (40 rows), tiled at
    # 32 rows per block -> exercises the masked last tile (out-of-bounds rows
    # plus softmax over padded columns).
    H2, W2 = 63, 80
    inputs2 = jax.random.normal(k3, (N, n_classes, H2, W2), dtype=jnp.float32)
    target2 = jax.random.randint(k4, (N, H2, W2), 0, n_classes, dtype=jnp.int32)
    for sm in (False, True):
        out2 = dice_loss_pallas(inputs2, target2, weight, softmax=sm,
                                block_rows=32)
        jax.block_until_ready(out2)
        ref2 = dice_loss_ref(inputs2, target2, weight, softmax=sm)
        assert jnp.allclose(out2, ref2, rtol=1e-5, atol=1e-5), (sm, out2, ref2)

    print("KERNEL_OK")
</pallas_src>

<mosaic_0001>
module attributes {stable_mosaic.version = 11 : i64} {
  func.func @_dice_partials_kernel(%arg0: i32, %arg1: i32, %arg2: memref<1x4x8x128xf32, #tpu.memory_space<vmem>>, %arg3: memref<1x8x128xi8, #tpu.memory_space<vmem>>, %arg4: memref<1x12x8x128xf32, #tpu.memory_space<vmem>>) attributes {dimension_semantics = [#tpu.dimension_semantics<parallel>, #tpu.dimension_semantics<arbitrary>], iteration_bounds = array<i64: 2, 1>, scalar_prefetch = 0 : i64, scratch_operands = 0 : i64, tpu.core_type = #tpu.core_type<tc>, window_params = [{transform_indices = @transform_0, window_bounds = array<i64: 1, 4, 8, 128>}, {transform_indices = @transform_1, window_bounds = array<i64: 1, 8, 128>}, {transform_indices = @transform_2, window_bounds = array<i64: 1, 12, 8, 128>}]} {
    %c0_i32 = arith.constant 0 : i32
    %0 = arith.cmpi eq, %arg1, %c0_i32 : i32
    %1 = arith.extui %0 : i1 to i32
    %c0_i32_0 = arith.constant 0 : i32
    %2 = arith.cmpi ne, %1, %c0_i32_0 : i32
    scf.if %2 {
      %cst_116 = arith.constant 0.000000e+00 : f32
      %118 = vector.broadcast %cst_116 : f32 to vector<1x12x8x128xf32>
      %c0_117 = arith.constant 0 : index
      %c0_118 = arith.constant 0 : index
      %c0_119 = arith.constant 0 : index
      %c0_120 = arith.constant 0 : index
      %119 = vector.load %arg4[%c0_117, %c0_118, %c0_119, %c0_120] : memref<1x12x8x128xf32, #tpu.memory_space<vmem>>, vector<1x12x8x128xf32>
      tpu.vector_store %arg4[%c0_117, %c0_118, %c0_119, %c0_120], %118 {strides = array<i32>} : memref<1x12x8x128xf32, #tpu.memory_space<vmem>>, vector<1x12x8x128xf32>,
    } else {
    }
    %c0 = arith.constant 0 : index
    %c0_1 = arith.constant 0 : index
    %c0_2 = arith.constant 0 : index
    %3 = vector.load %arg3[%c0, %c0_1, %c0_2] : memref<1x8x128xi8, #tpu.memory_space<vmem>>, vector<1x8x128xi8>
    %4 = vector.shape_cast %3 : vector<1x8x128xi8> to vector<8x128xi8>
    %5 = arith.extsi %4 : vector<8x128xi8> to vector<8x128xi32>
    %c0_3 = arith.constant 0 : index
    %c0_4 = arith.constant 0 : index
    %c0_5 = arith.constant 0 : index
    %c0_6 = arith.constant 0 : index
    %6 = vector.load %arg2[%c0_3, %c0_4, %c0_5, %c0_6] : memref<1x4x8x128xf32, #tpu.memory_space<vmem>>, vector<1x1x8x128xf32>
    %7 = vector.shape_cast %6 : vector<1x1x8x128xf32> to vector<8x128xf32>
    %c0_7 = arith.constant 0 : index
    %c1 = arith.constant 1 : index
    %c0_8 = arith.constant 0 : index
    %c0_9 = arith.constant 0 : index
    %8 = vector.load %arg2[%c0_7, %c1, %c0_8, %c0_9] : memref<1x4x8x128xf32, #tpu.memory_space<vmem>>, vector<1x1x8x128xf32>
    %9 = vector.shape_cast %8 : vector<1x1x8x128xf32> to vector<8x128xf32>
    %c0_10 = arith.constant 0 : index
    %c2 = arith.constant 2 : index
    %c0_11 = arith.constant 0 : index
    %c0_12 = arith.constant 0 : index
    %10 = vector.load %arg2[%c0_10, %c2, %c0_11, %c0_12] : memref<1x4x8x128xf32, #tpu.memory_space<vmem>>, vector<1x1x8x128xf32>
    %11 = vector.shape_cast %10 : vector<1x1x8x128xf32> to vector<8x128xf32>
    %c0_13 = arith.constant 0 : index
    %c3 = arith.constant 3 : index
    %c0_14 = arith.constant 0 : index
    %c0_15 = arith.constant 0 : index
    %12 = vector.load %arg2[%c0_13, %c3, %c0_14, %c0_15] : memref<1x4x8x128xf32, #tpu.memory_space<vmem>>, vector<1x1x8x128xf32>
    %13 = vector.shape_cast %12 : vector<1x1x8x128xf32> to vector<8x128xf32>
    %c0_i32_16 = arith.constant 0 : i32
    %14 = vector.broadcast %c0_i32_16 : i32 to vector<8x128xi32>
    %15 = arith.cmpi eq, %5, %14 : vector<8x128xi32>
    %c0_17 = arith.constant 0 : index
    %c0_18 = arith.constant 0 : index
    %c0_19 = arith.constant 0 : index
    %c0_20 = arith.constant 0 : index
    %16 = vector.load %arg4[%c0_17, %c0_18, %c0_19, %c0_20] : memref<1x12x8x128xf32, #tpu.memory_space<vmem>>, vector<1x1x8x128xf32>
    %17 = vector.shape_cast %16 : vector<1x1x8x128xf32> to vector<8x128xf32>
    %cst = arith.constant 0.000000e+00 : f32
    %18 = vector.broadcast %cst : f32 to vector<8x128xf32>
    %19 = arith.select %15, %7, %18 : vector<8x128xi1>, vector<8x128xf32>
    %20 = arith.addf %17, %19 : vector<8x128xf32>
    %c0_21 = arith.constant 0 : index
    %c0_22 = arith.constant 0 : index
    %c0_23 = arith.constant 0 : index
    %c0_24 = arith.constant 0 : index
    %21 = vector.load %arg4[%c0_21, %c0_22, %c0_23, %c0_24] : memref<1x12x8x128xf32, #tpu.memory_space<vmem>>, vector<1x1x8x128xf32>
    %22 = vector.shape_cast %21 : vector<1x1x8x128xf32> to vector<8x128xf32>
    %23 = vector.shape_cast %20 : vector<8x128xf32> to vector<1x1x8x128xf32>
    tpu.vector_store %arg4[%c0_21, %c0_22, %c0_23, %c0_24], %23 {strides = array<i32>} : memref<1x12x8x128xf32, #tpu.memory_space<vmem>>, vector<1x1x8x128xf32>,
    %c0_25 = arith.constant 0 : index
    %c1_26 = arith.constant 1 : index
    %c0_27 = arith.constant 0 : index
    %c0_28 = arith.constant 0 : index
    %24 = vector.load %arg4[%c0_25, %c1_26, %c0_27, %c0_28] : memref<1x12x8x128xf32, #tpu.memory_space<vmem>>, vector<1x1x8x128xf32>
    %25 = vector.shape_cast %24 : vector<1x1x8x128xf32> to vector<8x128xf32>
    %cst_29 = arith.constant 1.000000e+00 : f32
    %cst_30 = arith.constant 0.000000e+00 : f32
    %26 = vector.broadcast %cst_29 : f32 to vector<8x128xf32>
    %27 = vector.broadcast %cst_30 : f32 to vector<8x128xf32>
    %28 = arith.select %15, %26, %27 : vector<8x128xi1>, vector<8x128xf32>
    %29 = arith.addf %25, %28 : vector<8x128xf32>
    %c0_31 = arith.constant 0 : index
    %c1_32 = arith.constant 1 : index
    %c0_33 = arith.constant 0 : index
    %c0_34 = arith.constant 0 : index
    %30 = vector.load %arg4[%c0_31, %c1_32, %c0_33, %c0_34] : memref<1x12x8x128xf32, #tpu.memory_space<vmem>>, vector<1x1x8x128xf32>
    %31 = vector.shape_cast %30 : vector<1x1x8x128xf32> to vector<8x128xf32>
    %32 = vector.shape_cast %29 : vector<8x128xf32> to vector<1x1x8x128xf32>
    tpu.vector_store %arg4[%c0_31, %c1_32, %c0_33, %c0_34], %32 {strides = array<i32>} : memref<1x12x8x128xf32, #tpu.memory_space<vmem>>, vector<1x1x8x128xf32>,
    %c0_35 = arith.constant 0 : index
    %c2_36 = arith.constant 2 : index
    %c0_37 = arith.constant 0 : index
    %c0_38 = arith.constant 0 : index
    %33 = vector.load %arg4[%c0_35, %c2_36, %c0_37, %c0_38] : memref<1x12x8x128xf32, #tpu.memory_space<vmem>>, vector<1x1x8x128xf32>
    %34 = vector.shape_cast %33 : vector<1x1x8x128xf32> to vector<8x128xf32>
    %35 = arith.mulf %7, %7 : vector<8x128xf32>
    %36 = arith.addf %34, %35 : vector<8x128xf32>
    %c0_39 = arith.constant 0 : index
    %c2_40 = arith.constant 2 : index
    %c0_41 = arith.constant 0 : index
    %c0_42 = arith.constant 0 : index
    %37 = vector.load %arg4[%c0_39, %c2_40, %c0_41, %c0_42] : memref<1x12x8x128xf32, #tpu.memory_space<vmem>>, vector<1x1x8x128xf32>
    %38 = vector.shape_cast %37 : vector<1x1x8x128xf32> to vector<8x128xf32>
    %39 = vector.shape_cast %36 : vector<8x128xf32> to vector<1x1x8x128xf32>
    tpu.vector_store %arg4[%c0_39, %c2_40, %c0_41, %c0_42], %39 {strides = array<i32>} : memref<1x12x8x128xf32, #tpu.memory_space<vmem>>, vector<1x1x8x128xf32>,
    %c1_i32 = arith.constant 1 : i32
    %40 = vector.broadcast %c1_i32 : i32 to vector<8x128xi32>
    %41 = arith.cmpi eq, %5, %40 : vector<8x128xi32>
    %c0_43 = arith.constant 0 : index
    %c3_44 = arith.constant 3 : index
    %c0_45 = arith.constant 0 : index
    %c0_46 = arith.constant 0 : index
    %42 = vector.load %arg4[%c0_43, %c3_44, %c0_45, %c0_46] : memref<1x12x8x128xf32, #tpu.memory_space<vmem>>, vector<1x1x8x128xf32>
    %43 = vector.shape_cast %42 : vector<1x1x8x128xf32> to vector<8x128xf32>
    %cst_47 = arith.constant 0.000000e+00 : f32
    %44 = vector.broadcast %cst_47 : f32 to vector<8x128xf32>
    %45 = arith.select %41, %9, %44 : vector<8x128xi1>, vector<8x128xf32>
    %46 = arith.addf %43, %45 : vector<8x128xf32>
    %c0_48 = arith.constant 0 : index
    %c3_49 = arith.constant 3 : index
    %c0_50 = arith.constant 0 : index
    %c0_51 = arith.constant 0 : index
    %47 = vector.load %arg4[%c0_48, %c3_49, %c0_50, %c0_51] : memref<1x12x8x128xf32, #tpu.memory_space<vmem>>, vector<1x1x8x128xf32>
    %48 = vector.shape_cast %47 : vector<1x1x8x128xf32> to vector<8x128xf32>
    %49 = vector.shape_cast %46 : vector<8x128xf32> to vector<1x1x8x128xf32>
    tpu.vector_store %arg4[%c0_48, %c3_49, %c0_50, %c0_51], %49 {strides = array<i32>} : memref<1x12x8x128xf32, #tpu.memory_space<vmem>>, vector<1x1x8x128xf32>,
    %c0_52 = arith.constant 0 : index
    %c4 = arith.constant 4 : index
    %c0_53 = arith.constant 0 : index
    %c0_54 = arith.constant 0 : index
    %50 = vector.load %arg4[%c0_52, %c4, %c0_53, %c0_54] : memref<1x12x8x128xf32, #tpu.memory_space<vmem>>, vector<1x1x8x128xf32>
    %51 = vector.shape_cast %50 : vector<1x1x8x128xf32> to vector<8x128xf32>
    %cst_55 = arith.constant 1.000000e+00 : f32
    %cst_56 = arith.constant 0.000000e+00 : f32
    %52 = vector.broadcast %cst_55 : f32 to vector<8x128xf32>
    %53 = vector.broadcast %cst_56 : f32 to vector<8x128xf32>
    %54 = arith.select %41, %52, %53 : vector<8x128xi1>, vector<8x128xf32>
    %55 = arith.addf %51, %54 : vector<8x128xf32>
    %c0_57 = arith.constant 0 : index
    %c4_58 = arith.constant 4 : index
    %c0_59 = arith.constant 0 : index
    %c0_60 = arith.constant 0 : index
    %56 = vector.load %arg4[%c0_57, %c4_58, %c0_59, %c0_60] : memref<1x12x8x128xf32, #tpu.memory_space<vmem>>, vector<1x1x8x128xf32>
    %57 = vector.shape_cast %56 : vector<1x1x8x128xf32> to vector<8x128xf32>
    %58 = vector.shape_cast %55 : vector<8x128xf32> to vector<1x1x8x128xf32>
    tpu.vector_store %arg4[%c0_57, %c4_58, %c0_59, %c0_60], %58 {strides = array<i32>} : memref<1x12x8x128xf32, #tpu.memory_space<vmem>>, vector<1x1x8x128xf32>,
    %c0_61 = arith.constant 0 : index
    %c5 = arith.constant 5 : index
    %c0_62 = arith.constant 0 : index
    %c0_63 = arith.constant 0 : index
    %59 = vector.load %arg4[%c0_61, %c5, %c0_62, %c0_63] : memref<1x12x8x128xf32, #tpu.memory_space<vmem>>, vector<1x1x8x128xf32>
    %60 = vector.shape_cast %59 : vector<1x1x8x128xf32> to vector<8x128xf32>
    %61 = arith.mulf %9, %9 : vector<8x128xf32>
    %62 = arith.addf %60, %61 : vector<8x128xf32>
    %c0_64 = arith.constant 0 : index
    %c5_65 = arith.constant 5 : index
    %c0_66 = arith.constant 0 : index
    %c0_67 = arith.constant 0 : index
    %63 = vector.load %arg4[%c0_64, %c5_65, %c0_66, %c0_67] : memref<1x12x8x128xf32, #tpu.memory_space<vmem>>, vector<1x1x8x128xf32>
    %64 = vector.shape_cast %63 : vector<1x1x8x128xf32> to vector<8x128xf32>
    %65 = vector.shape_cast %62 : vector<8x128xf32> to vector<1x1x8x128xf32>
    tpu.vector_store %arg4[%c0_64, %c5_65, %c0_66, %c0_67], %65 {strides = array<i32>} : memref<1x12x8x128xf32, #tpu.memory_space<vmem>>, vector<1x1x8x128xf32>,
    %c2_i32 = arith.constant 2 : i32
    %66 = vector.broadcast %c2_i32 : i32 to vector<8x128xi32>
    %67 = arith.cmpi eq, %5, %66 : vector<8x128xi32>
    %c0_68 = arith.constant 0 : index
    %c6 = arith.constant 6 : index
    %c0_69 = arith.constant 0 : index
    %c0_70 = arith.constant 0 : index
    %68 = vector.load %arg4[%c0_68, %c6, %c0_69, %c0_70] : memref<1x12x8x128xf32, #tpu.memory_space<vmem>>, vector<1x1x8x128xf32>
    %69 = vector.shape_cast %68 : vector<1x1x8x128xf32> to vector<8x128xf32>
    %cst_71 = arith.constant 0.000000e+00 : f32
    %70 = vector.broadcast %cst_71 : f32 to vector<8x128xf32>
    %71 = arith.select %67, %11, %70 : vector<8x128xi1>, vector<8x128xf32>
    %72 = arith.addf %69, %71 : vector<8x128xf32>
    %c0_72 = arith.constant 0 : index
    %c6_73 = arith.constant 6 : index
    %c0_74 = arith.constant 0 : index
    %c0_75 = arith.constant 0 : index
    %73 = vector.load %arg4[%c0_72, %c6_73, %c0_74, %c0_75] : memref<1x12x8x128xf32, #tpu.memory_space<vmem>>, vector<1x1x8x128xf32>
    %74 = vector.shape_cast %73 : vector<1x1x8x128xf32> to vector<8x128xf32>
    %75 = vector.shape_cast %72 : vector<8x128xf32> to vector<1x1x8x128xf32>
    tpu.vector_store %arg4[%c0_72, %c6_73, %c0_74, %c0_75], %75 {strides = array<i32>} : memref<1x12x8x128xf32, #tpu.memory_space<vmem>>, vector<1x1x8x128xf32>,
    %c0_76 = arith.constant 0 : index
    %c7 = arith.constant 7 : index
    %c0_77 = arith.constant 0 : index
    %c0_78 = arith.constant 0 : index
    %76 = vector.load %arg4[%c0_76, %c7, %c0_77, %c0_78] : memref<1x12x8x128xf32, #tpu.memory_space<vmem>>, vector<1x1x8x128xf32>
    %77 = vector.shape_cast %76 : vector<1x1x8x128xf32> to vector<8x128xf32>
    %cst_79 = arith.constant 1.000000e+00 : f32
    %cst_80 = arith.constant 0.000000e+00 : f32
    %78 = vector.broadcast %cst_79 : f32 to vector<8x128xf32>
    %79 = vector.broadcast %cst_80 : f32 to vector<8x128xf32>
    %80 = arith.select %67, %78, %79 : vector<8x128xi1>, vector<8x128xf32>
    %81 = arith.addf %77, %80 : vector<8x128xf32>
    %c0_81 = arith.constant 0 : index
    %c7_82 = arith.constant 7 : index
    %c0_83 = arith.constant 0 : index
    %c0_84 = arith.constant 0 : index
    %82 = vector.load %arg4[%c0_81, %c7_82, %c0_83, %c0_84] : memref<1x12x8x128xf32, #tpu.memory_space<vmem>>, vector<1x1x8x128xf32>
    %83 = vector.shape_cast %82 : vector<1x1x8x128xf32> to vector<8x128xf32>
    %84 = vector.shape_cast %81 : vector<8x128xf32> to vector<1x1x8x128xf32>
    tpu.vector_store %arg4[%c0_81, %c7_82, %c0_83, %c0_84], %84 {strides = array<i32>} : memref<1x12x8x128xf32, #tpu.memory_space<vmem>>, vector<1x1x8x128xf32>,
    %c0_85 = arith.constant 0 : index
    %c8 = arith.constant 8 : index
    %c0_86 = arith.constant 0 : index
    %c0_87 = arith.constant 0 : index
    %85 = vector.load %arg4[%c0_85, %c8, %c0_86, %c0_87] : memref<1x12x8x128xf32, #tpu.memory_space<vmem>>, vector<1x1x8x128xf32>
    %86 = vector.shape_cast %85 : vector<1x1x8x128xf32> to vector<8x128xf32>
    %87 = arith.mulf %11, %11 : vector<8x128xf32>
    %88 = arith.addf %86, %87 : vector<8x128xf32>
    %c0_88 = arith.constant 0 : index
    %c8_89 = arith.constant 8 : index
    %c0_90 = arith.constant 0 : index
    %c0_91 = arith.constant 0 : index
    %89 = vector.load %arg4[%c0_88, %c8_89, %c0_90, %c0_91] : memref<1x12x8x128xf32, #tpu.memory_space<vmem>>, vector<1x1x8x128xf32>
    %90 = vector.shape_cast %89 : vector<1x1x8x128xf32> to vector<8x128xf32>
    %91 = vector.shape_cast %88 : vector<8x128xf32> to vector<1x1x8x128xf32>
    tpu.vector_store %arg4[%c0_88, %c8_89, %c0_90, %c0_91], %91 {strides = array<i32>} : memref<1x12x8x128xf32, #tpu.memory_space<vmem>>, vector<1x1x8x128xf32>,
    %c3_i32 = arith.constant 3 : i32
    %92 = vector.broadcast %c3_i32 : i32 to vector<8x128xi32>
    %93 = arith.cmpi eq, %5, %92 : vector<8x128xi32>
    %c0_92 = arith.constant 0 : index
    %c9 = arith.constant 9 : index
    %c0_93 = arith.constant 0 : index
    %c0_94 = arith.constant 0 : index
    %94 = vector.load %arg4[%c0_92, %c9, %c0_93, %c0_94] : memref<1x12x8x128xf32, #tpu.memory_space<vmem>>, vector<1x1x8x128xf32>
    %95 = vector.shape_cast %94 : vector<1x1x8x128xf32> to vector<8x128xf32>
    %cst_95 = arith.constant 0.000000e+00 : f32
    %96 = vector.broadcast %cst_95 : f32 to vector<8x128xf32>
    %97 = arith.select %93, %13, %96 : vector<8x128xi1>, vector<8x128xf32>
    %98 = arith.addf %95, %97 : vector<8x128xf32>
    %c0_96 = arith.constant 0 : index
    %c9_97 = arith.constant 9 : index
    %c0_98 = arith.constant 0 : index
    %c0_99 = arith.constant 0 : index
    %99 = vector.load %arg4[%c0_96, %c9_97, %c0_98, %c0_99] : memref<1x12x8x128xf32, #tpu.memory_space<vmem>>, vector<1x1x8x128xf32>
    %100 = vector.shape_cast %99 : vector<1x1x8x128xf32> to vector<8x128xf32>
    %101 = vector.shape_cast %98 : vector<8x128xf32> to vector<1x1x8x128xf32>
    tpu.vector_store %arg4[%c0_96, %c9_97, %c0_98, %c0_99], %101 {strides = array<i32>} : memref<1x12x8x128xf32, #tpu.memory_space<vmem>>, vector<1x1x8x128xf32>,
    %c0_100 = arith.constant 0 : index
    %c10 = arith.constant 10 : index
    %c0_101 = arith.constant 0 : index
    %c0_102 = arith.constant 0 : index
    %102 = vector.load %arg4[%c0_100, %c10, %c0_101, %c0_102] : memref<1x12x8x128xf32, #tpu.memory_space<vmem>>, vector<1x1x8x128xf32>
    %103 = vector.shape_cast %102 : vector<1x1x8x128xf32> to vector<8x128xf32>
    %cst_103 = arith.constant 1.000000e+00 : f32
    %cst_104 = arith.constant 0.000000e+00 : f32
    %104 = vector.broadcast %cst_103 : f32 to vector<8x128xf32>
    %105 = vector.broadcast %cst_104 : f32 to vector<8x128xf32>
    %106 = arith.select %93, %104, %105 : vector<8x128xi1>, vector<8x128xf32>
    %107 = arith.addf %103, %106 : vector<8x128xf32>
    %c0_105 = arith.constant 0 : index
    %c10_106 = arith.constant 10 : index
    %c0_107 = arith.constant 0 : index
    %c0_108 = arith.constant 0 : index
    %108 = vector.load %arg4[%c0_105, %c10_106, %c0_107, %c0_108] : memref<1x12x8x128xf32, #tpu.memory_space<vmem>>, vector<1x1x8x128xf32>
    %109 = vector.shape_cast %108 : vector<1x1x8x128xf32> to vector<8x128xf32>
    %110 = vector.shape_cast %107 : vector<8x128xf32> to vector<1x1x8x128xf32>
    tpu.vector_store %arg4[%c0_105, %c10_106, %c0_107, %c0_108], %110 {strides = array<i32>} : memref<1x12x8x128xf32, #tpu.memory_space<vmem>>, vector<1x1x8x128xf32>,
    %c0_109 = arith.constant 0 : index
    %c11 = arith.constant 11 : index
    %c0_110 = arith.constant 0 : index
    %c0_111 = arith.constant 0 : index
    %111 = vector.load %arg4[%c0_109, %c11, %c0_110, %c0_111] : memref<1x12x8x128xf32, #tpu.memory_space<vmem>>, vector<1x1x8x128xf32>
    %112 = vector.shape_cast %111 : vector<1x1x8x128xf32> to vector<8x128xf32>
    %113 = arith.mulf %13, %13 : vector<8x128xf32>
    %114 = arith.addf %112, %113 : vector<8x128xf32>
    %c0_112 = arith.constant 0 : index
    %c11_113 = arith.constant 11 : index
    %c0_114 = arith.constant 0 : index
    %c0_115 = arith.constant 0 : index
    %115 = vector.load %arg4[%c0_112, %c11_113, %c0_114, %c0_115] : memref<1x12x8x128xf32, #tpu.memory_space<vmem>>, vector<1x1x8x128xf32>
    %116 = vector.shape_cast %115 : vector<1x1x8x128xf32> to vector<8x128xf32>
    %117 = vector.shape_cast %114 : vector<8x128xf32> to vector<1x1x8x128xf32>
    tpu.vector_store %arg4[%c0_112, %c11_113, %c0_114, %c0_115], %117 {strides = array<i32>} : memref<1x12x8x128xf32, #tpu.memory_space<vmem>>, vector<1x1x8x128xf32>,
    return
  }
  func.func @transform_0(%arg0: i32, %arg1: i32) -> (i32, i32, i32, i32) {
    %c0_i32 = arith.constant 0 : i32
    %c0_i32_0 = arith.constant 0 : i32
    %c0_i32_1 = arith.constant 0 : i32
    return %arg0, %c0_i32, %arg1, %c0_i32_0 : i32, i32, i32, i32
  }
  func.func @transform_1(%arg0: i32, %arg1: i32) -> (i32, i32, i32) {
    %c0_i32 = arith.constant 0 : i32
    %c0_i32_0 = arith.constant 0 : i32
    return %arg0, %arg1, %c0_i32 : i32, i32, i32
  }
  func.func @transform_2(%arg0: i32, %arg1: i32) -> (i32, i32, i32, i32) {
    %c0_i32 = arith.constant 0 : i32
    %c0_i32_0 = arith.constant 0 : i32
    %c0_i32_1 = arith.constant 0 : i32
    %c0_i32_2 = arith.constant 0 : i32
    return %arg0, %c0_i32, %c0_i32_0, %c0_i32_1 : i32, i32, i32, i32
  }
}

</mosaic_0001>

<bundles_post_ra>
// kernel: tpu_custom_call.1
= control target key start
LH: loop header
LB: loop body
LE: loop exit
PB: predicated region body
PF: predicated region fallthrough
CT: control target
= control target key end

     0   :  { %7 = vsyncpa [#allocation3], 0  ;;  %s930_s0 = inlined_call_operand.hbm [shape: f32[2,4,8,128], index: 0, kind: input, shape index: {}]   ;;  %s931_s1 = inlined_call_operand.hbm [shape: s8[2,8,128], index: 1, kind: input, shape index: {}]   ;;  %s932_s2 = inlined_call_operand.hbm [shape: f32[2,12,8,128], index: 2, kind: output, shape index: {}]  }
   0x1   :  { %9 = vsyncpa [#allocation3 + $0x1], 0 }
   0x2   :  { %10 = vsyncpa [#allocation6], 0 }
   0x3   :  { %12 = vsyncpa [#allocation6 + $0x1], 0 }
   0x4   :  { %13 = vsyncpa [#allocation4], 0 }
   0x5   :  { %15 = vsyncpa [#allocation4 + $0x1], 0  ;;  %s712_s9 = smov 0   ;;  %s714_s10 = smov 0  }
   0x6   :  { %s716_s11 = smov 0   ;;  %s718_s12 = smov 0  }
   0x7   :  { %s720_s13 = smov 0   ;;  %s722_s14 = smov 0  }
   0x8 LB: > { %s426_s15 = sadd.s32 4294967295, %s687_s14   ;;  %s427_s16 = sadd.s32 4294967294, %s687_s14   ;;  %s687_s14 = sphi %s722_s14, %s21_s14   ;;  %s683_s13 = sphi %s720_s13, %s951_s13   ;;  %s679_s12 = sphi %s718_s12, %s950_s12   ;;  %s675_s11 = sphi %s716_s11, %s949_s11   ;;  %s671_s10 = sphi %s714_s10, %s948_s10   ;;  %s667_s9 = sphi %s712_s9, %s947_s9  }
   0x9   : > { %s33_s17 = sadd.s32 1, %s683_s13  ;;  %s42_s18 = sadd.s32 1, %s675_s11 }
   0xa   : > { %p35_p0 = scmp.ge.s32.totalorder %s33_s17, 2  ;;  %p49_p1 = scmp.ne.s32.totalorder %s675_s11, %s671_s10 }
   0xb   : > { %p50_p2 = scmp.eq.s32.totalorder %s687_s14, 0  ;;  %p55_p3 = scmp.ne.s32.totalorder %s671_s10, %s667_s9 }
   0xc   : > { %s953_s17 = smov (%p35_p0, %s33_s17), 0  ;;  %p56_p5 = scmp.eq.s32.totalorder %s426_s15, 0 }
   0xd   : > { %p753_p4 = por %p50_p2, %p49_p1  ;;  %s37_s20 = ssub.s32 %s683_s13, %s953_s17 }
   0xe   : > { %p107_p6 = scmp.eq.s32.totalorder %s426_s15, 1  ;;  %p40_p7 = scmp.eq.s32.totalorder %s37_s20, 0 }
   0xf   : > { %p759_p8 = por %p56_p5, %p55_p3  ;;  %p113_p10 = scmp.eq.s32.totalorder %s427_s16, 1 }
  0x10   : > { %p763_p9 = por %p107_p6, %p49_p1  ;;  %p486_p13 = scmp.lt.s32.totalorder %s687_s14, 2 }
  0x11   : > { %s936_s21 = scalar_select %p759_p8, 1, 0 }
  0x12   : > { %s937_s22 = scalar_select %p763_p9, 1, 0 }
  0x13   : > { %s768_s23 = scalar_select %p40_p7, %s675_s11, %s42_s18  }
  0x14   : > { %p770_p11 = por %p113_p10, %p55_p3  ;;  %s777_s25 = sand.u32 1, %s675_s11  }
  0x15   : > { %s430_s26 = sshll.u32 %s777_s25, 5  ;;  %s466_s27 = sshll.u32 %s683_s13, 9 }
  0x16   : > { %s938_s24 = scalar_select %p770_p11, 1, 0 }
  0x17   : > { %s784_s30 = scalar_lea.hbm %s930_s0, %s466_s27  ;;  %s137_s3 = scalar_lea.vmem [#allocation2], %s430_s26 }
  0x18   : > { %s145_s4 = sshll.u32 %s137_s3, 4  ;;  %p790_p0 = pnand %p486_p13, %p753_p4  ;;  %s786_s4 = int_to_ptr.vmem [resolvable:$true] %s145_s4 }
  0x19   : > { %s134_s6 = scalar_lea.sflag [#allocation3], %s777_s25  ;;  %s541_s7 = scalar_lea.hbm %s784_s30, 512 }
  0x1a   : > { %p542_p2 = scmp.ne.s32.totalorder %s784_s30, %s541_s7  ;;  %p543_p3 = pneg %p790_p0 }
  0x1b   : > { %s546_s16 = scalar_lea.hbm %s930_s0, 1024  ;;  %p547_p4 = scmp.lt.u32.totalorder %s784_s30, %s930_s0 }
  0x1c   : > { %p544_p5 = pnand %p543_p3, %p542_p2  ;;  %p548_p7 = scmp.lt.u32.totalorder %s546_s16, %s541_s7 }
  0x1d   : > { %p550_p13 = scmp.lt.u32.totalorder %s541_s7, %s784_s30 }
  0x1e   : > { %p545_p6 = pneg %p544_p5  ;;  %p549_p10 = por %p548_p7, %p547_p4 }
  0x20   : > { %p551_p12 = por %p550_p13, %p549_p10 }
  0x22   : > { %p552_p1 = pnand %p551_p12, %p545_p6 }
  0x24   : > { %555 = shalt.err (!%p552_p1)
}
  0x25   : > { %s556_s20 = scalar_lea.vmem %s786_s4, 512  ;;  %s689_s26 = smov [#allocation2]  }
  0x26   : > { %p557_p2 = scmp.ne.s32.totalorder %s786_s4, %s556_s20  ;;  %s561_s27 = sshll.u32 %s689_s26, 4  ;;  %s562_s27 = int_to_ptr.vmem [resolvable:$false] %s561_s27 }
  0x27   : > { %s563_s28 = scalar_lea.vmem %s562_s27, 1024  ;;  %p564_p9 = scmp.lt.s32.totalorder %s786_s4, %s562_s27 }
  0x28   : > { %p559_p5 = pnand %p557_p2, %p543_p3  ;;  %p565_p4 = scmp.lt.s32.totalorder %s563_s28, %s556_s20 }
  0x2a   : > { %p560_p11 = pneg %p559_p5  ;;  %p566_p7 = por %p565_p4, %p564_p9 }
  0x2c   : > { %p567_p10 = pnand %p566_p7, %p560_p11 }
  0x2e   : > { %570 = shalt.err (!%p567_p10)
}
  0x2f   : > { %s690_s29 = smov 128   ;;  %s691_s3 = smov 8  }
  0x30   : > { %478 = dma.hbm_to_vmem [thread:$0]  (!%p790_p0), %s784_s30, 512, %s786_s4, %s134_s6, %s690_s29, %s690_s29, %s691_s3  }
  0x31   : > { %p172_p12 = scmp.lt.s32.totalorder %s687_s14, 3  ;;  %s433_s7 = sshll.u32 %s777_s25, 1 }
  0x32   : > { %s434_s8 = sshll.u32 %s683_s13, 5  ;;  %p940_p9 = scmp.ge.s32.totalorder %s687_s14, 1 }
  0x33   : > { %s835_s19 = scalar_lea.hbm %s931_s1, %s434_s8  ;;  %s159_s20 = scalar_lea.vmem [#allocation5], %s433_s7 }
  0x34   : > { %p828_p11 = pnand %p940_p9, %p172_p12  ;;  %s167_s26 = sshll.u32 %s159_s20, 4  ;;  %s168_s26 = int_to_ptr.vmem [resolvable:$true] %s167_s26 }
  0x35   : > { %s156_s30 = scalar_lea.sflag [#allocation6], %s777_s25  ;;  %s571_s4 = scalar_lea.hbm %s835_s19, 32 }
  0x36   : > { %s941_s15 = scalar_select %p828_p11, 1, 0 }
  0x37   : > { %p572_p1 = scmp.ne.s32.totalorder %s835_s19, %s571_s4  ;;  %s576_s28 = scalar_lea.hbm %s931_s1, 64 }
  0x38   : > { %p577_p2 = scmp.lt.u32.totalorder %s835_s19, %s931_s1  ;;  %p578_p5 = scmp.lt.u32.totalorder %s576_s28, %s571_s4 }
  0x39   : > { %p574_p6 = pnand %p572_p1, %p543_p3  ;;  %p580_p7 = scmp.lt.u32.totalorder %s571_s4, %s835_s19 }
  0x3a   : > { %p579_p4 = por %p578_p5, %p577_p2 }
  0x3b   : > { %p575_p13 = pneg %p574_p6 }
  0x3c   : > { %p581_p10 = por %p580_p7, %p579_p4 }
  0x3e   : > { %p582_p12 = pnand %p581_p10, %p575_p13 }
  0x40   : > { %585 = shalt.err (!%p582_p12)
}
  0x41   : > { %s586_s25 = scalar_lea.vmem %s168_s26, 32  ;;  %s692_s7 = smov [#allocation5]  }
  0x42   : > { %p587_p9 = scmp.ne.s32.totalorder %s168_s26, %s586_s25  ;;  %s591_s8 = sshll.u32 %s692_s7, 4  ;;  %s592_s8 = int_to_ptr.vmem [resolvable:$false] %s591_s8 }
  0x43   : > { %s593_s16 = scalar_lea.vmem %s592_s8, 64  ;;  %p594_p8 = scmp.lt.s32.totalorder %s168_s26, %s592_s8 }
  0x44   : > { %p589_p1 = pnand %p587_p9, %p543_p3  ;;  %p595_p11 = scmp.lt.s32.totalorder %s593_s16, %s586_s25 }
  0x46   : > { %p590_p6 = pneg %p589_p1  ;;  %p596_p2 = por %p595_p11, %p594_p8 }
  0x48   : > { %p597_p5 = pnand %p596_p2, %p590_p6 }
  0x4a   : > { %600 = shalt.err (!%p597_p5)
}
  0x4b   : > { %481 = dma.hbm_to_vmem [thread:$0]  (!%p790_p0), %s835_s19, 32, %s168_s26, %s156_s30  }
  0x4c   : > { %p942_p13 = scmp.ne.s32.totalorder %s941_s15, 0 }
  0x4d   : > { %s860_s18 = sand.u32 (!%p942_p13), 1, %s671_s10   ;;  %p943_p3 = scmp.ne.s32.totalorder (!%p942_p13), %s936_s21, 0 }
  0x4e   : > { %176 = sbr.rel (%p942_p13) target bundleno = 118 (0x76), region = 28  ;;  %s436_s20 = sshll.u32 (!%p942_p13), %s860_s18, 5 }
  0x4f   : > { %s179_s4 = scalar_lea.sflag (!%p942_p13), [#allocation3], %s860_s18  ;;  %s182_s6 = scalar_lea.vmem (!%p942_p13), [#allocation2], %s436_s20 }
  0x55   : > { %654 = dma.done.wait (%p943_p3), %s179_s4, 512  }
  0x56   : > { %656 = vsyncadd (%p943_p3), %s179_s4, 4294966784  ;;  %s437_s5 = sshll.u32 %s860_s18, 1  ;;  %s188_s15 = scalar_lea.sflag [#allocation6], %s860_s18 }
  0x57   : > { %s191_s19 = scalar_lea.vmem [#allocation5], %s437_s5 }
  0x58   : > { %658 = dma.done.wait (%p943_p3), %s188_s15, 32  }
  0x59   : > { %660 = vsyncadd (%p943_p3), %s188_s15, 4294967264  ;;  %s467_s26 = smul.u32 96, %s860_s18  ;;  %v233_v0 = vld [vmem:[%s191_s19] sm:$0x3]  ;;  %v438_v2 = vld [vmem:[%s182_s6 + $0x8] sm:$0xff]  ;;  %v693_v11 = vmov 0.0  }
  0x5a   : > { %v235_v1 = vld [vmem:[%s182_s6] sm:$0xff]  ;;  %v234_v3 = vunpack.c.0.s8 %v233_v0  ;;  %v270_v5 = vmul.f32 %v438_v2, %v438_v2  ;;  %v439_v6 = vld [vmem:[%s182_s6 + $0x10] sm:$0xff]  ;;  %v440_v7 = vld [vmem:[%s182_s6 + $0x18] sm:$0xff]  ;;  %s468_s21 = smul.u32 1536, %s679_s12  ;;  %s306_s3 = scalar_lea.sflag [#allocation4], %s860_s18 }
  0x5b   : > { %v254_v4 = vmul.f32 %v235_v1, %v235_v1  ;;  %v286_v8 = vmul.f32 %v439_v6, %v439_v6  ;;  %v302_v9 = vmul.f32 %v440_v7, %v440_v7  ;;  %s216_s30 = scalar_lea.vmem [#allocation7], %s467_s26  ;;  %p944_p0 = scmp.ne.s32.totalorder %s937_s22, 0 }
  0x5c   : > { %vm242_vm0 = vcmp.eq.s32.totalorder %v234_v3, 0  ;;  %vm257_vm1 = vcmp.eq.s32.totalorder %v234_v3, 1  ;;  %450 = vst [vmem:[%s216_s30 + $0x28] sm:$0xff] %v270_v5  ;;  %s319_s27 = sshll.u32 %s216_s30, 4  ;;  %vm273_vm2 = vcmp.eq.s32.totalorder %v234_v3, 2  ;;  %vm289_vm3 = vcmp.eq.s32.totalorder %v234_v3, 3  ;;  %s879_s29 = scalar_lea.hbm %s932_s2, %s468_s21  ;;  %s881_s27 = int_to_ptr.vmem [resolvable:$true] %s319_s27 }
  0x5d   : > { %v244_v10 = vsel %vm242_vm0, %v235_v1, 0.0  ;;  %v249_v12 = vsel %vm242_vm0, 1.0, %v693_v11  ;;  %v260_v13 = vsel %vm257_vm1, %v438_v2, 0.0  ;;  %v265_v14 = vsel %vm257_vm1, 1.0, %v693_v11  ;;  %444 = vst [vmem:[%s216_s30 + $0x10] sm:$0xff] %v254_v4  ;;  %456 = vst [vmem:[%s216_s30 + $0x40] sm:$0xff] %v286_v8 }
  0x5e   : > { %246 = vst [vmem:[%s216_s30] sm:$0xff] %v244_v10  ;;  %442 = vst [vmem:[%s216_s30 + $0x8] sm:$0xff] %v249_v12  ;;  %v276_v15 = vsel %vm273_vm2, %v439_v6, 0.0  ;;  %v281_v16 = vsel %vm273_vm2, 1.0, %v693_v11  ;;  %v292_v17 = vsel %vm289_vm3, %v440_v7, 0.0  ;;  %v297_v18 = vsel %vm289_vm3, 1.0, %v693_v11  ;;  %s601_s25 = scalar_lea.vmem %s881_s27, 1536 }
  0x5f   : > { %446 = vst [vmem:[%s216_s30 + $0x18] sm:$0xff] %v260_v13  ;;  %448 = vst [vmem:[%s216_s30 + $0x20] sm:$0xff] %v265_v14  ;;  %p602_p8 = scmp.ne.s32.totalorder %s881_s27, %s601_s25  ;;  %s694_s7 = smov [#allocation7]  }
  0x60   : > { %462 = vst [vmem:[%s216_s30 + $0x58] sm:$0xff] %v302_v9  ;;  %452 = vst [vmem:[%s216_s30 + $0x30] sm:$0xff] %v276_v15  ;;  %s605_s8 = sshll.u32 %s694_s7, 4  ;;  %s606_s8 = int_to_ptr.vmem [resolvable:$false] %s605_s8 }
  0x61   : > { %454 = vst [vmem:[%s216_s30 + $0x38] sm:$0xff] %v281_v16  ;;  %458 = vst [vmem:[%s216_s30 + $0x48] sm:$0xff] %v292_v17  ;;  %p603_p11 = pnand %p602_p8, %p944_p0  ;;  %s607_s16 = scalar_lea.vmem %s606_s8, 3072 }
  0x62   : > { %460 = vst [vmem:[%s216_s30 + $0x50] sm:$0xff] %v297_v18  ;;  %p608_p7 = scmp.lt.s32.totalorder %s881_s27, %s606_s8  ;;  %p609_p10 = scmp.lt.s32.totalorder %s607_s16, %s601_s25 }
  0x63   : > { %p604_p4 = pneg %p603_p11 }
  0x64   : > { %p610_p12 = por %p609_p10, %p608_p7 }
  0x66   : > { %p611_p9 = pnand %p610_p12, %p604_p4 }
  0x68   : > { %614 = shalt.err (!%p611_p9)
}
  0x69   : > { %s615_s20 = scalar_lea.hbm %s879_s29, 1536  ;;  %s619_s5 = scalar_lea.hbm %s932_s2, 3072 }
  0x6a   : > { %p616_p1 = scmp.ne.s32.totalorder %s879_s29, %s615_s20  ;;  %p620_p5 = scmp.lt.u32.totalorder %s879_s29, %s932_s2 }
  0x6b   : > { %p621_p13 = scmp.lt.u32.totalorder %s619_s5, %s615_s20  ;;  %p623_p8 = scmp.lt.u32.totalorder %s615_s20, %s879_s29 }
  0x6c   : > { %p617_p6 = pnand %p616_p1, %p944_p0 }
  0x6d   : > { %p622_p3 = por %p621_p13, %p620_p5 }
  0x6e   : > { %p618_p2 = pneg %p617_p6 }
  0x6f   : > { %p624_p11 = por %p623_p8, %p622_p3 }
  0x71   : > { %p625_p4 = pnand %p624_p11, %p618_p2 }
  0x73   : > { %628 = shalt.err (!%p625_p4)
}
  0x74   : > { %s695_s26 = smov 128   ;;  %s696_s21 = smov 8  }
  0x75   : > { %473 = dma.vmem_to_hbm [thread:$0]  (%p944_p0), %s881_s27, 1536, %s879_s29, %s306_s3, %s695_s26, %s695_s26, %s696_s21  }
  0x76 PF: > { %s334_s30 = sand.u32 1, %s667_s9   ;;  %p945_p7 = scmp.ne.s32.totalorder %s938_s24, 0 }
  0x77   : > { %p946_p10 = scmp.ge.s32.totalorder %s687_s14, 2  ;;  %s335_s28 = scalar_lea.sflag [#allocation4], %s334_s30 }
  0x79   : > { %p483_p12 = pnand %p946_p10, %p945_p7 }
  0x7b   : > { %662 = dma.done.wait (!%p483_p12), %s335_s28, 1536  }
  0x7c   : > { %664 = vsyncadd (!%p483_p12), %s335_s28, 4294965760  ;;  %s21_s14 = sadd.s32 1, %s687_s14   ;;  %s947_s9 = smov %s671_s10 }
  0x7d   : > { %p18_p9 = scmp.ge.s32.totalorder %s21_s14, 4   ;;  %s948_s10 = smov %s675_s11 }
  0x7e   : > { %s949_s11 = smov %s768_s23  ;;  %s950_s12 = smov %s683_s13 }
  0x7f   : > { %s951_s13 = smov %s953_s17  ;;  %20 = sbr.rel (!%p18_p9) target bundleno = 8 (0x8), region = 104 }
  0x86   :  { %340 = vsyncpa [#allocation3], 1 }
  0x87   :  { %342 = vsyncpa [#allocation3 + $0x1], 1 }
  0x88   :  { %343 = vsyncpa [#allocation6], 1 }
  0x89   :  { %345 = vsyncpa [#allocation6 + $0x1], 1 }
  0x8a   :  { %346 = vsyncpa [#allocation4], 1 }
  0x8b   :  { %348 = vsyncpa [#allocation4 + $0x1], 1 }

</bundles_post_ra>
